<compile_context>
chip_gen: v6e
topology: v6e:2x2x1
jax: 0.10.0
libtpu: 0.0.40
codegen_flags: <defaults>
</compile_context>

<pallas_src>
import functools

import jax
import jax.numpy as jnp
from jax.experimental import pallas as pl
from jax.experimental.pallas import tpu as pltpu

NEG_SLOPE = 0.01  # PyTorch LeakyReLU default
LANE = 128


def _round_up(n, m):
    return ((n + m - 1) // m) * m


def _make_kernel(n_layers):
    """Kernel over refs: (x, w0, b0, ..., w_{L-1}, b_{L-1}, out)."""

    def kernel(*refs):
        x_ref = refs[0]
        out_ref = refs[-1]
        wb = refs[1:-1]

        h = x_ref[...]                                   # bf16 (TB, F_pad)

        # dense_block_0 .. dense_block_{L-2}: Linear -> Dropout(eval=id) -> LeakyReLU
        for li in range(n_layers - 1):
            w_ref = wb[2 * li]
            b_ref = wb[2 * li + 1]
            z = jnp.dot(h, w_ref[...],
                        preferred_element_type=jnp.float32) + b_ref[...]
            z = jnp.maximum(z, NEG_SLOPE * z)            # LeakyReLU, f32 VPU math
            h = z.astype(jnp.bfloat16)                   # bf16 feed to next MXU pass

        # final: Linear(c[-1], num_classes), no activation
        wf_ref = wb[-2]
        bf_ref = wb[-1]
        out_ref[...] = (jnp.dot(h, wf_ref[...],
                                preferred_element_type=jnp.float32)
                        + bf_ref[...])

    return kernel


def _pack_params(params):
    """Zero-pad every (fin, fout) weight to multiples of 128 and cast to bf16.

    Padding is numerically exact: zero rows/cols contribute 0 to the matmul,
    LeakyReLU(0) = 0, and padded final-bias columns are 0.
    Biases stay f32 as (1, fout_pad) rows.
    """
    packed = []
    for w, b in params:
        fin, fout = w.shape
        fin_p = _round_up(max(fin, LANE), LANE)
        fout_p = _round_up(max(fout, LANE), LANE)
        wp = jnp.zeros((fin_p, fout_p), jnp.float32).at[:fin, :fout].set(w)
        bp = jnp.zeros((1, fout_p), jnp.float32).at[:, :fout].set(b)
        packed.append((wp.astype(jnp.bfloat16), bp))
    return packed


@functools.partial(jax.jit, static_argnames=("num_classes", "tb"))
def classifier_head_forward(x, params, *, num_classes, tb=256):
    """params: list of (W, b) with W shaped (fin, fout), b shaped (1, fout)."""
    B, F = x.shape
    n_layers = len(params)

    packed = _pack_params(params)
    F_pad = packed[0][0].shape[0]
    NC_pad = packed[-1][0].shape[1]

    # Batch tile: multiple of 8 sublanes, up to `tb` (default 256 -> full MXU rows).
    TB = min(tb, _round_up(B, 8))
    B_pad = _round_up(B, TB)
    grid = (B_pad // TB,)

    # Zero-pad batch & feature dims; bf16 feed for the MXU.
    x_p = jnp.zeros((B_pad, F_pad), jnp.float32).at[:B, :F].set(x)
    x_p = x_p.astype(jnp.bfloat16)

    flat_args = [x_p]
    in_specs = [pl.BlockSpec((TB, F_pad), lambda i: (i, 0))]
    for w, b in packed:
        flat_args += [w, b]
        # Constant index_map -> weights/biases stay VMEM-resident across steps.
        in_specs += [pl.BlockSpec(w.shape, lambda i: (0, 0)),
                     pl.BlockSpec(b.shape, lambda i: (0, 0))]

    flops = 2 * B_pad * sum(w.shape[0] * w.shape[1] for w, _ in packed)
    bytes_accessed = (x_p.size * 2
                      + sum(w.size * 2 + b.size * 4 for w, b in packed)
                      + B_pad * NC_pad * 4)

    out = pl.pallas_call(
        _make_kernel(n_layers),
        out_shape=jax.ShapeDtypeStruct((B_pad, NC_pad), jnp.float32),
        grid=grid,
        in_specs=in_specs,
        out_specs=pl.BlockSpec((TB, NC_pad), lambda i: (i, 0)),
        compiler_params=pltpu.CompilerParams(
            dimension_semantics=("parallel",)),
        cost_estimate=pl.CostEstimate(flops=flops,
                                      transcendentals=0,
                                      bytes_accessed=bytes_accessed),
    )(*flat_args)

    return out[:B, :num_classes]


def init_params(key, in_c, num_classes):
    """Deterministic init mimicking nn.Linear (uniform(-1/sqrt(fin), 1/sqrt(fin)))."""
    c = [in_c, 512, 256, 128, 64]          # default channel schedule of ClassifierHead
    dims = list(zip(c[:-1], c[1:])) + [(c[-1], num_classes)]
    params = []
    for (fin, fout) in dims:
        key, kw, kb = jax.random.split(key, 3)
        bound = 1.0 / jnp.sqrt(jnp.float32(fin))
        # stored already transposed: (fin, fout)
        w = jax.random.uniform(kw, (fin, fout), jnp.float32, -bound, bound)
        b = jax.random.uniform(kb, (1, fout), jnp.float32, -bound, bound)
        params.append((w, b))
    return params


def _reference_forward_f32(x, params):
    h = x.astype(jnp.float32)
    for w, b in params[:-1]:
        h = h @ w + b
        h = jnp.maximum(h, NEG_SLOPE * h)
    wf, bf = params[-1]
    return h @ wf + bf


def _reference_forward_bf16(x, params):
    """Same bf16-feed / f32-accumulate recipe as the kernel."""
    h = x.astype(jnp.bfloat16)
    for w, b in params[:-1]:
        z = jnp.dot(h, w.astype(jnp.bfloat16),
                    preferred_element_type=jnp.float32) + b
        z = jnp.maximum(z, NEG_SLOPE * z)
        h = z.astype(jnp.bfloat16)
    wf, bf = params[-1]
    return jnp.dot(h, wf.astype(jnp.bfloat16),
                   preferred_element_type=jnp.float32) + bf


if __name__ == "__main__":
    B, IN_C, NUM_CLASSES = 8, 32, 10

    key = jax.random.PRNGKey(0)
    key, kx = jax.random.split(key)
    x = jax.random.normal(kx, (B, IN_C), jnp.float32)

    params = init_params(key, IN_C, NUM_CLASSES)

    out = classifier_head_forward(x, params, num_classes=NUM_CLASSES)
    out = jax.block_until_ready(out)

    assert out.shape == (B, NUM_CLASSES)
    ref_bf16 = _reference_forward_bf16(x, params)
    ref_f32 = _reference_forward_f32(x, params)
    assert jnp.allclose(out, ref_bf16, atol=2e-2, rtol=2e-2), "mismatch vs bf16 ref"
    assert jnp.allclose(out, ref_f32, atol=6e-2, rtol=6e-2), "mismatch vs f32 ref"

    print("KERNEL_OK")
</pallas_src>

<mosaic_0001>
module attributes {stable_mosaic.version = 11 : i64} {
  func.func @kernel(%arg0: i32, %arg1: memref<8x128xbf16, #tpu.memory_space<vmem>>, %arg2: memref<128x512xbf16, #tpu.memory_space<vmem>>, %arg3: memref<1x512xf32, #tpu.memory_space<vmem>>, %arg4: memref<512x256xbf16, #tpu.memory_space<vmem>>, %arg5: memref<1x256xf32, #tpu.memory_space<vmem>>, %arg6: memref<256x128xbf16, #tpu.memory_space<vmem>>, %arg7: memref<1x128xf32, #tpu.memory_space<vmem>>, %arg8: memref<128x128xbf16, #tpu.memory_space<vmem>>, %arg9: memref<1x128xf32, #tpu.memory_space<vmem>>, %arg10: memref<128x128xbf16, #tpu.memory_space<vmem>>, %arg11: memref<1x128xf32, #tpu.memory_space<vmem>>, %arg12: memref<8x128xf32, #tpu.memory_space<vmem>>) attributes {dimension_semantics = [#tpu.dimension_semantics<parallel>], iteration_bounds = array<i64: 1>, scalar_prefetch = 0 : i64, scratch_operands = 0 : i64, tpu.core_type = #tpu.core_type<tc>, window_params = [{transform_indices = @transform_0, window_bounds = array<i64: 8, 128>}, {pipeline_mode = #tpu.pipeline_mode<synchronous>, transform_indices = @transform_1, window_bounds = array<i64: 128, 512>}, {pipeline_mode = #tpu.pipeline_mode<synchronous>, transform_indices = @transform_2, window_bounds = array<i64: 1, 512>}, {pipeline_mode = #tpu.pipeline_mode<synchronous>, transform_indices = @transform_3, window_bounds = array<i64: 512, 256>}, {pipeline_mode = #tpu.pipeline_mode<synchronous>, transform_indices = @transform_4, window_bounds = array<i64: 1, 256>}, {pipeline_mode = #tpu.pipeline_mode<synchronous>, transform_indices = @transform_5, window_bounds = array<i64: 256, 128>}, {pipeline_mode = #tpu.pipeline_mode<synchronous>, transform_indices = @transform_6, window_bounds = array<i64: 1, 128>}, {pipeline_mode = #tpu.pipeline_mode<synchronous>, transform_indices = @transform_7, window_bounds = array<i64: 128, 128>}, {pipeline_mode = #tpu.pipeline_mode<synchronous>, transform_indices = @transform_8, window_bounds = array<i64: 1, 128>}, {pipeline_mode = #tpu.pipeline_mode<synchronous>, transform_indices = @transform_9, window_bounds = array<i64: 128, 128>}, {pipeline_mode = #tpu.pipeline_mode<synchronous>, transform_indices = @transform_10, window_bounds = array<i64: 1, 128>}, {transform_indices = @transform_11, window_bounds = array<i64: 8, 128>}]} {
    %c0 = arith.constant 0 : index
    %c0_0 = arith.constant 0 : index
    %0 = vector.load %arg1[%c0, %c0_0] : memref<8x128xbf16, #tpu.memory_space<vmem>>, vector<8x128xbf16>
    %c0_1 = arith.constant 0 : index
    %c0_2 = arith.constant 0 : index
    %1 = vector.load %arg2[%c0_1, %c0_2] : memref<128x512xbf16, #tpu.memory_space<vmem>>, vector<128x512xbf16>
    %cst = arith.constant dense<0.000000e+00> : vector<8x512xf32>
    %2 = tpu.matmul %0, %1, %cst {dimension_numbers = #tpu.dot_dimension_numbers<[1], [0], [0], [1], [0, 0, 1, 1], [], []>} : vector<8x128xbf16>, vector<128x512xbf16>, vector<8x512xf32> -> vector<8x512xf32>
    %c0_3 = arith.constant 0 : index
    %c0_4 = arith.constant 0 : index
    %3 = vector.load %arg3[%c0_3, %c0_4] : memref<1x512xf32, #tpu.memory_space<vmem>>, vector<1x512xf32>
    %4 = vector.broadcast %3 : vector<1x512xf32> to vector<8x512xf32>
    %5 = arith.addf %2, %4 : vector<8x512xf32>
    %cst_5 = arith.constant 0.00999999977 : f32
    %6 = vector.broadcast %cst_5 : f32 to vector<8x512xf32>
    %7 = arith.mulf %6, %5 : vector<8x512xf32>
    %8 = arith.maximumf %5, %7 : vector<8x512xf32>
    %9 = arith.truncf %8 : vector<8x512xf32> to vector<8x512xbf16>
    %c0_6 = arith.constant 0 : index
    %c0_7 = arith.constant 0 : index
    %10 = vector.load %arg4[%c0_6, %c0_7] : memref<512x256xbf16, #tpu.memory_space<vmem>>, vector<512x256xbf16>
    %cst_8 = arith.constant dense<0.000000e+00> : vector<8x256xf32>
    %11 = tpu.matmul %9, %10, %cst_8 {dimension_numbers = #tpu.dot_dimension_numbers<[1], [0], [0], [1], [0, 0, 1, 1], [], []>} : vector<8x512xbf16>, vector<512x256xbf16>, vector<8x256xf32> -> vector<8x256xf32>
    %c0_9 = arith.constant 0 : index
    %c0_10 = arith.constant 0 : index
    %12 = vector.load %arg5[%c0_9, %c0_10] : memref<1x256xf32, #tpu.memory_space<vmem>>, vector<1x256xf32>
    %13 = vector.broadcast %12 : vector<1x256xf32> to vector<8x256xf32>
    %14 = arith.addf %11, %13 : vector<8x256xf32>
    %cst_11 = arith.constant 0.00999999977 : f32
    %15 = vector.broadcast %cst_11 : f32 to vector<8x256xf32>
    %16 = arith.mulf %15, %14 : vector<8x256xf32>
    %17 = arith.maximumf %14, %16 : vector<8x256xf32>
    %18 = arith.truncf %17 : vector<8x256xf32> to vector<8x256xbf16>
    %c0_12 = arith.constant 0 : index
    %c0_13 = arith.constant 0 : index
    %19 = vector.load %arg6[%c0_12, %c0_13] : memref<256x128xbf16, #tpu.memory_space<vmem>>, vector<256x128xbf16>
    %cst_14 = arith.constant dense<0.000000e+00> : vector<8x128xf32>
    %20 = tpu.matmul %18, %19, %cst_14 {dimension_numbers = #tpu.dot_dimension_numbers<[1], [0], [0], [1], [0, 0, 1, 1], [], []>} : vector<8x256xbf16>, vector<256x128xbf16>, vector<8x128xf32> -> vector<8x128xf32>
    %c0_15 = arith.constant 0 : index
    %c0_16 = arith.constant 0 : index
    %21 = vector.load %arg7[%c0_15, %c0_16] : memref<1x128xf32, #tpu.memory_space<vmem>>, vector<1x128xf32>
    %22 = vector.broadcast %21 : vector<1x128xf32> to vector<8x128xf32>
    %23 = arith.addf %20, %22 : vector<8x128xf32>
    %cst_17 = arith.constant 0.00999999977 : f32
    %24 = vector.broadcast %cst_17 : f32 to vector<8x128xf32>
    %25 = arith.mulf %24, %23 : vector<8x128xf32>
    %26 = arith.maximumf %23, %25 : vector<8x128xf32>
    %27 = arith.truncf %26 : vector<8x128xf32> to vector<8x128xbf16>
    %c0_18 = arith.constant 0 : index
    %c0_19 = arith.constant 0 : index
    %28 = vector.load %arg8[%c0_18, %c0_19] : memref<128x128xbf16, #tpu.memory_space<vmem>>, vector<128x128xbf16>
    %cst_20 = arith.constant dense<0.000000e+00> : vector<8x128xf32>
    %29 = tpu.matmul %27, %28, %cst_20 {dimension_numbers = #tpu.dot_dimension_numbers<[1], [0], [0], [1], [0, 0, 1, 1], [], []>} : vector<8x128xbf16>, vector<128x128xbf16>, vector<8x128xf32> -> vector<8x128xf32>
    %c0_21 = arith.constant 0 : index
    %c0_22 = arith.constant 0 : index
    %30 = vector.load %arg9[%c0_21, %c0_22] : memref<1x128xf32, #tpu.memory_space<vmem>>, vector<1x128xf32>
    %31 = vector.broadcast %30 : vector<1x128xf32> to vector<8x128xf32>
    %32 = arith.addf %29, %31 : vector<8x128xf32>
    %cst_23 = arith.constant 0.00999999977 : f32
    %33 = vector.broadcast %cst_23 : f32 to vector<8x128xf32>
    %34 = arith.mulf %33, %32 : vector<8x128xf32>
    %35 = arith.maximumf %32, %34 : vector<8x128xf32>
    %36 = arith.truncf %35 : vector<8x128xf32> to vector<8x128xbf16>
    %c0_24 = arith.constant 0 : index
    %c0_25 = arith.constant 0 : index
    %37 = vector.load %arg10[%c0_24, %c0_25] : memref<128x128xbf16, #tpu.memory_space<vmem>>, vector<128x128xbf16>
    %cst_26 = arith.constant dense<0.000000e+00> : vector<8x128xf32>
    %38 = tpu.matmul %36, %37, %cst_26 {dimension_numbers = #tpu.dot_dimension_numbers<[1], [0], [0], [1], [0, 0, 1, 1], [], []>} : vector<8x128xbf16>, vector<128x128xbf16>, vector<8x128xf32> -> vector<8x128xf32>
    %c0_27 = arith.constant 0 : index
    %c0_28 = arith.constant 0 : index
    %39 = vector.load %arg11[%c0_27, %c0_28] : memref<1x128xf32, #tpu.memory_space<vmem>>, vector<1x128xf32>
    %40 = vector.broadcast %39 : vector<1x128xf32> to vector<8x128xf32>
    %41 = arith.addf %38, %40 : vector<8x128xf32>
    %c0_29 = arith.constant 0 : index
    %c0_30 = arith.constant 0 : index
    %42 = vector.load %arg12[%c0_29, %c0_30] : memref<8x128xf32, #tpu.memory_space<vmem>>, vector<8x128xf32>
    tpu.vector_store %arg12[%c0_29, %c0_30], %41 {strides = array<i32>} : memref<8x128xf32, #tpu.memory_space<vmem>>, vector<8x128xf32>,
    return
  }
  func.func @transform_0(%arg0: i32) -> (i32, i32) {
    %c0_i32 = arith.constant 0 : i32
    %c0_i32_0 = arith.constant 0 : i32
    return %arg0, %c0_i32 : i32, i32
  }
  func.func @transform_1(%arg0: i32) -> (i32, i32) {
    %c0_i32 = arith.constant 0 : i32
    %c0_i32_0 = arith.constant 0 : i32
    %c0_i32_1 = arith.constant 0 : i32
    return %c0_i32, %c0_i32_0 : i32, i32
  }
  func.func @transform_2(%arg0: i32) -> (i32, i32) {
    %c0_i32 = arith.constant 0 : i32
    %c0_i32_0 = arith.constant 0 : i32
    %c0_i32_1 = arith.constant 0 : i32
    return %c0_i32, %c0_i32_0 : i32, i32
  }
  func.func @transform_3(%arg0: i32) -> (i32, i32) {
    %c0_i32 = arith.constant 0 : i32
    %c0_i32_0 = arith.constant 0 : i32
    %c0_i32_1 = arith.constant 0 : i32
    return %c0_i32, %c0_i32_0 : i32, i32
  }
  func.func @transform_4(%arg0: i32) -> (i32, i32) {
    %c0_i32 = arith.constant 0 : i32
    %c0_i32_0 = arith.constant 0 : i32
    %c0_i32_1 = arith.constant 0 : i32
    return %c0_i32, %c0_i32_0 : i32, i32
  }
  func.func @transform_5(%arg0: i32) -> (i32, i32) {
    %c0_i32 = arith.constant 0 : i32
    %c0_i32_0 = arith.constant 0 : i32
    %c0_i32_1 = arith.constant 0 : i32
    return %c0_i32, %c0_i32_0 : i32, i32
  }
  func.func @transform_6(%arg0: i32) -> (i32, i32) {
    %c0_i32 = arith.constant 0 : i32
    %c0_i32_0 = arith.constant 0 : i32
    %c0_i32_1 = arith.constant 0 : i32
    return %c0_i32, %c0_i32_0 : i32, i32
  }
  func.func @transform_7(%arg0: i32) -> (i32, i32) {
    %c0_i32 = arith.constant 0 : i32
    %c0_i32_0 = arith.constant 0 : i32
    %c0_i32_1 = arith.constant 0 : i32
    return %c0_i32, %c0_i32_0 : i32, i32
  }
  func.func @transform_8(%arg0: i32) -> (i32, i32) {
    %c0_i32 = arith.constant 0 : i32
    %c0_i32_0 = arith.constant 0 : i32
    %c0_i32_1 = arith.constant 0 : i32
    return %c0_i32, %c0_i32_0 : i32, i32
  }
  func.func @transform_9(%arg0: i32) -> (i32, i32) {
    %c0_i32 = arith.constant 0 : i32
    %c0_i32_0 = arith.constant 0 : i32
    %c0_i32_1 = arith.constant 0 : i32
    return %c0_i32, %c0_i32_0 : i32, i32
  }
  func.func @transform_10(%arg0: i32) -> (i32, i32) {
    %c0_i32 = arith.constant 0 : i32
    %c0_i32_0 = arith.constant 0 : i32
    %c0_i32_1 = arith.constant 0 : i32
    return %c0_i32, %c0_i32_0 : i32, i32
  }
  func.func @transform_11(%arg0: i32) -> (i32, i32) {
    %c0_i32 = arith.constant 0 : i32
    %c0_i32_0 = arith.constant 0 : i32
    return %arg0, %c0_i32 : i32, i32
  }
}

</mosaic_0001>

<bundles_post_ra>
// kernel: classifier_head_forward.1
= control target key start
LH: loop header
LB: loop body
LE: loop exit
PB: predicated region body
PF: predicated region fallthrough
CT: control target
= control target key end

     0   :  { %v1664_v2 = vmov 0   ;;  %s2165_s0 = inlined_call_operand.vmem [shape: bf16[8,128], index: 0, kind: input, shape index: {}]   ;;  %s2166_s1 = inlined_call_operand.vmem [shape: bf16[128,512], index: 1, kind: input, shape index: {}]   ;;  %s2167_s2 = inlined_call_operand.vmem [shape: f32[1,512], index: 2, kind: input, shape index: {}]   ;;  %s2168_s3 = inlined_call_operand.vmem [shape: bf16[512,256], index: 3, kind: input, shape index: {}]   ;;  %s2169_s4 = inlined_call_operand.vmem [shape: f32[1,256], index: 4, kind: input, shape index: {}]   ;;  %s2170_s5 = inlined_call_operand.vmem [shape: bf16[256,128], index: 5, kind: input, shape index: {}]   ;;  %s2171_s6 = inlined_call_operand.vmem [shape: f32[1,128], index: 6, kind: input, shape index: {}]   ;;  %s2172_s7 = inlined_call_operand.vmem [shape: bf16[128,128], index: 7, kind: input, shape index: {}]   ;;  %s2173_s8 = inlined_call_operand.vmem [shape: f32[1,128], index: 8, kind: input, shape index: {}]   ;;  %s2174_s9 = inlined_call_operand.vmem [shape: bf16[128,128], index: 9, kind: input, shape index: {}]   ;;  %s2175_s10 = inlined_call_operand.vmem [shape: f32[1,128], index: 10, kind: input, shape index: {}]   ;;  %s2176_s11 = inlined_call_operand.hbm [shape: f32[8,128], index: 11, kind: output, shape index: {}]  }
   0x1   :  { %v1466_v0 = vld [vmem:[%s2166_s1 + $0xe4] ss:$16 sps:$4 sm:$0xff]   ;;  %v1468_v1 = vld [vmem:[%s2166_s1 + $0xec] ss:$16 sps:$4 sm:$0xff]   ;;  %287 = vmatprep.mubr.bf16.mxu0 %v1664_v2  ;;  %328 = vmatprep.mubr.bf16.mxu1 %v1664_v2  ;;  %v1470_v3 = vld [vmem:[%s2166_s1 + $0xe0] ss:$16 sps:$4 sm:$0xff]  }
   0x2   :  { %255 = vmatprep.subr.bf16.mxu0 %v1466_v0  ;;  %v1471_v4 = vld [vmem:[%s2166_s1 + $0xe8] ss:$16 sps:$4 sm:$0xff]   ;;  %296 = vmatprep.subr.bf16.mxu1 %v1468_v1  ;;  %v1472_v5 = vld [vmem:[%s2166_s1 + $0xc4] ss:$16 sps:$4 sm:$0xff]   ;;  %v1474_v6 = vld [vmem:[%s2166_s1 + $0xcc] ss:$16 sps:$4 sm:$0xff]  }
   0x3   :  { %256 = vmatpush1.bf16.msra.mxu0 %v1470_v3  ;;  %297 = vmatpush1.bf16.msra.mxu1 %v1471_v4  ;;  %v1476_v7 = vld [vmem:[%s2166_s1 + $0xc0] ss:$16 sps:$4 sm:$0xff]   ;;  %v1477_v8 = vld [vmem:[%s2166_s1 + $0xc8] ss:$16 sps:$4 sm:$0xff]   ;;  %v1478_v9 = vld [vmem:[%s2166_s1 + $0xa4] ss:$16 sps:$4 sm:$0xff]  }
   0x4   :  { %257 = vmatprep.subr.bf16.mxu0 %v1472_v5  ;;  %298 = vmatprep.subr.bf16.mxu1 %v1474_v6  ;;  %v1480_v10 = vld [vmem:[%s2166_s1 + $0xac] ss:$16 sps:$4 sm:$0xff]   ;;  %v1482_v11 = vld [vmem:[%s2166_s1 + $0xa0] ss:$16 sps:$4 sm:$0xff]   ;;  %v1483_v12 = vld [vmem:[%s2166_s1 + $0xa8] ss:$16 sps:$4 sm:$0xff]  }
   0x5   :  { %v1484_v13 = vld [vmem:[%s2166_s1 + $0x84] ss:$16 sps:$4 sm:$0xff]   ;;  %v1486_v14 = vld [vmem:[%s2166_s1 + $0x8c] ss:$16 sps:$4 sm:$0xff]   ;;  %v1488_v15 = vld [vmem:[%s2166_s1 + $0x80] ss:$16 sps:$4 sm:$0xff]  }
   0x6   :  { %v1489_v16 = vld [vmem:[%s2166_s1 + $0x88] ss:$16 sps:$4 sm:$0xff]   ;;  %v1490_v17 = vld [vmem:[%s2166_s1 + $0x64] ss:$16 sps:$4 sm:$0xff]   ;;  %v1492_v18 = vld [vmem:[%s2166_s1 + $0x6c] ss:$16 sps:$4 sm:$0xff]  }
   0x7   :  { %258 = vmatpush1.bf16.msra.mxu0 %v1476_v7  ;;  %299 = vmatpush1.bf16.msra.mxu1 %v1477_v8  ;;  %v1494_v19 = vld [vmem:[%s2166_s1 + $0x60] ss:$16 sps:$4 sm:$0xff]   ;;  %v1495_v20 = vld [vmem:[%s2166_s1 + $0x68] ss:$16 sps:$4 sm:$0xff]   ;;  %v1496_v21 = vld [vmem:[%s2166_s1 + $0x44] ss:$16 sps:$4 sm:$0xff]  }
   0x8   :  { %259 = vmatprep.subr.bf16.mxu0 %v1478_v9  ;;  %300 = vmatprep.subr.bf16.mxu1 %v1480_v10  ;;  %v1498_v22 = vld [vmem:[%s2166_s1 + $0x4c] ss:$16 sps:$4 sm:$0xff]   ;;  %v1500_v23 = vld [vmem:[%s2166_s1 + $0x40] ss:$16 sps:$4 sm:$0xff]   ;;  %v1501_v24 = vld [vmem:[%s2166_s1 + $0x48] ss:$16 sps:$4 sm:$0xff]  }
   0x9   :  { %v1502_v25 = vld [vmem:[%s2166_s1 + $0x24] ss:$16 sps:$4 sm:$0xff]   ;;  %v1504_v26 = vld [vmem:[%s2166_s1 + $0x2c] ss:$16 sps:$4 sm:$0xff]   ;;  %v1506_v27 = vld [vmem:[%s2166_s1 + $0x20] ss:$16 sps:$4 sm:$0xff]  }
   0xa   :  { %v1507_v28 = vld [vmem:[%s2166_s1 + $0x28] ss:$16 sps:$4 sm:$0xff]   ;;  %v1508_v29 = vld [vmem:[%s2166_s1 + $0x4] ss:$16 sps:$4 sm:$0xff]   ;;  %v1510_v30 = vld [vmem:[%s2166_s1 + $0xc] ss:$16 sps:$4 sm:$0xff]  }
   0xb   :  { %260 = vmatpush1.bf16.msra.mxu0 %v1482_v11  ;;  %301 = vmatpush1.bf16.msra.mxu1 %v1483_v12  ;;  %v1512_v31 = vld [vmem:[%s2166_s1] ss:$16 sps:$4 sm:$0xff]   ;;  %v1513_v32 = vld [vmem:[%s2166_s1 + $0x8] ss:$16 sps:$4 sm:$0xff]   ;;  %v1516_v33 = vld [vmem:[%s2168_s3 + $0x74] ss:$8 sps:$4 sm:$0xff]  }
   0xc   :  { %261 = vmatprep.subr.bf16.mxu0 %v1484_v13  ;;  %302 = vmatprep.subr.bf16.mxu1 %v1486_v14  ;;  %v1519_v34 = vld [vmem:[%s2168_s3 + $0x174] ss:$8 sps:$4 sm:$0xff]   ;;  %v40_v35 = vld [vmem:[%s2165_s0] sm:$0xf]  ;;  %v1514_v36 = vld [vmem:[%s2168_s3 + $0x70] ss:$8 sps:$4 sm:$0xff]  }
   0xd   :  { %v1517_v37 = vld [vmem:[%s2168_s3 + $0x170] ss:$8 sps:$4 sm:$0xff]   ;;  %v1522_v38 = vld [vmem:[%s2168_s3 + $0x64] ss:$8 sps:$4 sm:$0xff]   ;;  %v1520_v40 = vld [vmem:[%s2168_s3 + $0x60] ss:$8 sps:$4 sm:$0xff]  }
   0xe   :  { %v1525_v39 = vld [vmem:[%s2168_s3 + $0x164] ss:$8 sps:$4 sm:$0xff]   ;;  %v1523_v41 = vld [vmem:[%s2168_s3 + $0x160] ss:$8 sps:$4 sm:$0xff]   ;;  %v1528_v42 = vld [vmem:[%s2168_s3 + $0x54] ss:$8 sps:$4 sm:$0xff]  }
   0xf   :  { %262 = vmatpush1.bf16.msra.mxu0 %v1488_v15  ;;  %303 = vmatpush1.bf16.msra.mxu1 %v1489_v16  ;;  %v1531_v43 = vld [vmem:[%s2168_s3 + $0x154] ss:$8 sps:$4 sm:$0xff]   ;;  %v1526_v44 = vld [vmem:[%s2168_s3 + $0x50] ss:$8 sps:$4 sm:$0xff]   ;;  %v1534_v46 = vld [vmem:[%s2168_s3 + $0x44] ss:$8 sps:$4 sm:$0xff]  }
  0x10   :  { %263 = vmatprep.subr.bf16.mxu0 %v1490_v17  ;;  %304 = vmatprep.subr.bf16.mxu1 %v1492_v18  ;;  %v1529_v45 = vld [vmem:[%s2168_s3 + $0x150] ss:$8 sps:$4 sm:$0xff]   ;;  %v1537_v47 = vld [vmem:[%s2168_s3 + $0x144] ss:$8 sps:$4 sm:$0xff]   ;;  %v1532_v48 = vld [vmem:[%s2168_s3 + $0x40] ss:$8 sps:$4 sm:$0xff]  }
  0x11   :  { %v1535_v49 = vld [vmem:[%s2168_s3 + $0x140] ss:$8 sps:$4 sm:$0xff]   ;;  %v1540_v50 = vld [vmem:[%s2168_s3 + $0x34] ss:$8 sps:$4 sm:$0xff]   ;;  %v1538_v52 = vld [vmem:[%s2168_s3 + $0x30] ss:$8 sps:$4 sm:$0xff]  }
  0x12   :  { %v1543_v51 = vld [vmem:[%s2168_s3 + $0x134] ss:$8 sps:$4 sm:$0xff]   ;;  %v1541_v53 = vld [vmem:[%s2168_s3 + $0x130] ss:$8 sps:$4 sm:$0xff]   ;;  %v1546_v54 = vld [vmem:[%s2168_s3 + $0x24] ss:$8 sps:$4 sm:$0xff]  }
  0x13   :  { %264 = vmatpush1.bf16.msra.mxu0 %v1494_v19  ;;  %305 = vmatpush1.bf16.msra.mxu1 %v1495_v20  ;;  %v1549_v55 = vld [vmem:[%s2168_s3 + $0x124] ss:$8 sps:$4 sm:$0xff]   ;;  %v1544_v56 = vld [vmem:[%s2168_s3 + $0x20] ss:$8 sps:$4 sm:$0xff]   ;;  %v1552_v58 = vld [vmem:[%s2168_s3 + $0x14] ss:$8 sps:$4 sm:$0xff]  }
  0x14   :  { %265 = vmatprep.subr.bf16.mxu0 %v1496_v21  ;;  %306 = vmatprep.subr.bf16.mxu1 %v1498_v22  ;;  %v1547_v57 = vld [vmem:[%s2168_s3 + $0x120] ss:$8 sps:$4 sm:$0xff]   ;;  %v1555_v59 = vld [vmem:[%s2168_s3 + $0x114] ss:$8 sps:$4 sm:$0xff]   ;;  %v1550_v60 = vld [vmem:[%s2168_s3 + $0x10] ss:$8 sps:$4 sm:$0xff]  }
  0x15   :  { %v1553_v61 = vld [vmem:[%s2168_s3 + $0x110] ss:$8 sps:$4 sm:$0xff]   ;;  %v1558_v62 = vld [vmem:[%s2168_s3 + $0x4] ss:$8 sps:$4 sm:$0xff]   ;;  %v1556_v0 = vld [vmem:[%s2168_s3] ss:$8 sps:$4 sm:$0xff]  }
  0x16   :  { %v1561_v63 = vld [vmem:[%s2168_s3 + $0x104] ss:$8 sps:$4 sm:$0xff]   ;;  %v1559_v1 = vld [vmem:[%s2168_s3 + $0x100] ss:$8 sps:$4 sm:$0xff]   ;;  %v1564_v2 = vld [vmem:[%s2168_s3 + $0xf4] ss:$8 sps:$4 sm:$0xff]  }
  0x17   :  { %266 = vmatpush1.bf16.msra.mxu0 %v1500_v23  ;;  %307 = vmatpush1.bf16.msra.mxu1 %v1501_v24  ;;  %v1567_v3 = vld [vmem:[%s2168_s3 + $0x1f4] ss:$8 sps:$4 sm:$0xff]   ;;  %v1562_v4 = vld [vmem:[%s2168_s3 + $0xf0] ss:$8 sps:$4 sm:$0xff]   ;;  %v1570_v6 = vld [vmem:[%s2168_s3 + $0xe4] ss:$8 sps:$4 sm:$0xff]  }
  0x18   :  { %267 = vmatprep.subr.bf16.mxu0 %v1502_v25  ;;  %308 = vmatprep.subr.bf16.mxu1 %v1504_v26  ;;  %v1565_v5 = vld [vmem:[%s2168_s3 + $0x1f0] ss:$8 sps:$4 sm:$0xff]   ;;  %v1573_v7 = vld [vmem:[%s2168_s3 + $0x1e4] ss:$8 sps:$4 sm:$0xff]   ;;  %v1568_v8 = vld [vmem:[%s2168_s3 + $0xe0] ss:$8 sps:$4 sm:$0xff]  }
  0x19   :  { %v1571_v9 = vld [vmem:[%s2168_s3 + $0x1e0] ss:$8 sps:$4 sm:$0xff]   ;;  %v1576_v10 = vld [vmem:[%s2168_s3 + $0xd4] ss:$8 sps:$4 sm:$0xff]   ;;  %v1574_v12 = vld [vmem:[%s2168_s3 + $0xd0] ss:$8 sps:$4 sm:$0xff]  }
  0x1a   :  { %v1579_v11 = vld [vmem:[%s2168_s3 + $0x1d4] ss:$8 sps:$4 sm:$0xff]   ;;  %v1577_v13 = vld [vmem:[%s2168_s3 + $0x1d0] ss:$8 sps:$4 sm:$0xff]   ;;  %v1582_v14 = vld [vmem:[%s2168_s3 + $0xc4] ss:$8 sps:$4 sm:$0xff]  }
  0x1b   :  { %268 = vmatpush1.bf16.msra.mxu0 %v1506_v27  ;;  %309 = vmatpush1.bf16.msra.mxu1 %v1507_v28  ;;  %v1585_v15 = vld [vmem:[%s2168_s3 + $0x1c4] ss:$8 sps:$4 sm:$0xff]   ;;  %v1580_v16 = vld [vmem:[%s2168_s3 + $0xc0] ss:$8 sps:$4 sm:$0xff]   ;;  %v1588_v18 = vld [vmem:[%s2168_s3 + $0xb4] ss:$8 sps:$4 sm:$0xff]  }
  0x1c   :  { %269 = vmatprep.subr.bf16.mxu0 %v1508_v29  ;;  %310 = vmatprep.subr.bf16.mxu1 %v1510_v30  ;;  %v1583_v17 = vld [vmem:[%s2168_s3 + $0x1c0] ss:$8 sps:$4 sm:$0xff]   ;;  %v1591_v19 = vld [vmem:[%s2168_s3 + $0x1b4] ss:$8 sps:$4 sm:$0xff]   ;;  %v1586_v20 = vld [vmem:[%s2168_s3 + $0xb0] ss:$8 sps:$4 sm:$0xff]  }
  0x1d   :  { %v1589_v21 = vld [vmem:[%s2168_s3 + $0x1b0] ss:$8 sps:$4 sm:$0xff]  }
  0x1f   :  { %270 = vmatpush1.bf16.msra.mxu0 %v1512_v31  ;;  %311 = vmatpush1.bf16.msra.mxu1 %v1513_v32 }
  0x20   :  { %745 = vmatprep.subr.bf16.mxu0 %v1516_v33  ;;  %786 = vmatprep.subr.bf16.mxu1 %v1519_v34 }
  0x22   :  { %288 = vmatmul.mubr.bf16.vlgmr.msra.gmra.mxu0 %v40_v35  ;;  %329 = vmatmul.mubr.bf16.vlgmr.msra.gmra.mxu1 %v40_v35 }
  0x23   :  { %746 = vmatpush1.bf16.msra.mxu0 %v1514_v36  ;;  %787 = vmatpush1.bf16.msra.mxu1 %v1517_v37 }
  0x24   :  { %747 = vmatprep.subr.bf16.mxu0 %v1522_v38  ;;  %788 = vmatprep.subr.bf16.mxu1 %v1525_v39 }
  0x27   :  { %748 = vmatpush1.bf16.msra.mxu0 %v1520_v40  ;;  %789 = vmatpush1.bf16.msra.mxu1 %v1523_v41 }
  0x28   :  { %749 = vmatprep.subr.bf16.mxu0 %v1528_v42  ;;  %790 = vmatprep.subr.bf16.mxu1 %v1531_v43 }
  0x2b   :  { %750 = vmatpush1.bf16.msra.mxu0 %v1526_v44  ;;  %791 = vmatpush1.bf16.msra.mxu1 %v1529_v45 }
  0x2c   :  { %751 = vmatprep.subr.bf16.mxu0 %v1534_v46  ;;  %792 = vmatprep.subr.bf16.mxu1 %v1537_v47 }
  0x2f   :  { %752 = vmatpush1.bf16.msra.mxu0 %v1532_v48  ;;  %793 = vmatpush1.bf16.msra.mxu1 %v1535_v49 }
  0x30   :  { %753 = vmatprep.subr.bf16.mxu0 %v1540_v50  ;;  %794 = vmatprep.subr.bf16.mxu1 %v1543_v51 }
  0x33   :  { %754 = vmatpush1.bf16.msra.mxu0 %v1538_v52  ;;  %795 = vmatpush1.bf16.msra.mxu1 %v1541_v53 }
  0x34   :  { %755 = vmatprep.subr.bf16.mxu0 %v1546_v54  ;;  %796 = vmatprep.subr.bf16.mxu1 %v1549_v55 }
  0x37   :  { %756 = vmatpush1.bf16.msra.mxu0 %v1544_v56  ;;  %797 = vmatpush1.bf16.msra.mxu1 %v1547_v57 }
  0x38   :  { %757 = vmatprep.subr.bf16.mxu0 %v1552_v58  ;;  %798 = vmatprep.subr.bf16.mxu1 %v1555_v59 }
  0x3b   :  { %758 = vmatpush1.bf16.msra.mxu0 %v1550_v60  ;;  %799 = vmatpush1.bf16.msra.mxu1 %v1553_v61 }
  0x3c   :  { %759 = vmatprep.subr.bf16.mxu0 %v1558_v62  ;;  %800 = vmatprep.subr.bf16.mxu1 %v1561_v63 }
  0x3f   :  { %760 = vmatpush1.bf16.msra.mxu0 %v1556_v0  ;;  %801 = vmatpush1.bf16.msra.mxu1 %v1559_v1 }
  0x40   :  { %761 = vmatprep.subr.bf16.mxu0 %v1564_v2  ;;  %802 = vmatprep.subr.bf16.mxu1 %v1567_v3 }
  0x43   :  { %762 = vmatpush2.bf16.msra.mxu0 %v1562_v4  ;;  %803 = vmatpush2.bf16.msra.mxu1 %v1565_v5 }
  0x44   :  { %763 = vmatprep.subr.bf16.mxu0 %v1570_v6  ;;  %804 = vmatprep.subr.bf16.mxu1 %v1573_v7 }
  0x47   :  { %764 = vmatpush2.bf16.msra.mxu0 %v1568_v8  ;;  %805 = vmatpush2.bf16.msra.mxu1 %v1571_v9 }
  0x48   :  { %765 = vmatprep.subr.bf16.mxu0 %v1576_v10  ;;  %806 = vmatprep.subr.bf16.mxu1 %v1579_v11 }
  0x4b   :  { %766 = vmatpush2.bf16.msra.mxu0 %v1574_v12  ;;  %807 = vmatpush2.bf16.msra.mxu1 %v1577_v13 }
  0x4c   :  { %767 = vmatprep.subr.bf16.mxu0 %v1582_v14  ;;  %808 = vmatprep.subr.bf16.mxu1 %v1585_v15 }
  0x4f   :  { %768 = vmatpush2.bf16.msra.mxu0 %v1580_v16  ;;  %809 = vmatpush2.bf16.msra.mxu1 %v1583_v17 }
  0x50   :  { %769 = vmatprep.subr.bf16.mxu0 %v1588_v18  ;;  %810 = vmatprep.subr.bf16.mxu1 %v1591_v19 }
  0x51   :  { %16 = vsyncpa [#allocation3], 0  ;;  %v1594_v22 = vld [vmem:[%s2168_s3 + $0xa4] ss:$8 sps:$4 sm:$0xff]   ;;  %v1592_v24 = vld [vmem:[%s2168_s3 + $0xa0] ss:$8 sps:$4 sm:$0xff]   ;;  %v75_v35 = vlaneseq }
  0x52   :  { %v1597_v23 = vld [vmem:[%s2168_s3 + $0x1a4] ss:$8 sps:$4 sm:$0xff]   ;;  %v1595_v25 = vld [vmem:[%s2168_s3 + $0x1a0] ss:$8 sps:$4 sm:$0xff]   ;;  %v1600_v26 = vld [vmem:[%s2168_s3 + $0x94] ss:$8 sps:$4 sm:$0xff]  }
  0x53   :  { %770 = vmatpush2.bf16.msra.mxu0 %v1586_v20  ;;  %811 = vmatpush2.bf16.msra.mxu1 %v1589_v21  ;;  %v1603_v27 = vld [vmem:[%s2168_s3 + $0x194] ss:$8 sps:$4 sm:$0xff]   ;;  %v1598_v28 = vld [vmem:[%s2168_s3 + $0x90] ss:$8 sps:$4 sm:$0xff]   ;;  %v1606_v30 = vld [vmem:[%s2168_s3 + $0x84] ss:$8 sps:$4 sm:$0xff]  }
  0x54   :  { %771 = vmatprep.subr.bf16.mxu0 %v1594_v22  ;;  %812 = vmatprep.subr.bf16.mxu1 %v1597_v23  ;;  %v1601_v29 = vld [vmem:[%s2168_s3 + $0x190] ss:$8 sps:$4 sm:$0xff]   ;;  %v1609_v31 = vld [vmem:[%s2168_s3 + $0x184] ss:$8 sps:$4 sm:$0xff]   ;;  %v1604_v32 = vld [vmem:[%s2168_s3 + $0x80] ss:$8 sps:$4 sm:$0xff]  }
  0x55   :  { %v1607_v33 = vld [vmem:[%s2168_s3 + $0x180] ss:$8 sps:$4 sm:$0xff]   ;;  %v1610_v34 = vld [vmem:[%s2170_s5 + $0x78] sm:$0xff]   ;;  %v2022_v36 = vshrl.u32 %v75_v35, 7  ;;  %v1612_v7 = vld [vmem:[%s2170_s5 + $0x70] sm:$0xff]   ;;  %v1665_v22 = vmov 0.0  }
  0x56   :  { %v73_v39 = vld [vmem:[%s2167_s2] sm:$0xf]  ;;  %v1611_v4 = vld [vmem:[%s2170_s5 + $0x38] sm:$0xff]   ;;  %v1613_v8 = vld [vmem:[%s2170_s5 + $0x30] sm:$0xff]   ;;  %vm1666_vm0 = vmmov 0   ;;  %s1667_s27 = smov [#allocation2]  }
  0x57   :  { %772 = vmatpush2.bf16.msra.mxu0 %v1592_v24  ;;  %813 = vmatpush2.bf16.msra.mxu1 %v1595_v25  ;;  %v77_v37 = vsub.s32 0, %v2022_v36  ;;  %v85_v38 = vsub.s32 2, %v2022_v36  ;;  %v81_v40 = vsub.s32 1, %v2022_v36  ;;  %v89_v41 = vsub.s32 3, %v2022_v36  ;;  %v1614_v9 = vld [vmem:[%s2170_s5 + $0x68] sm:$0xff]   ;;  %v1616_v11 = vld [vmem:[%s2170_s5 + $0x60] sm:$0xff]  }
  0x58   :  { %773 = vmatprep.subr.bf16.mxu0 %v1600_v26  ;;  %814 = vmatprep.subr.bf16.mxu1 %v1603_v27  ;;  %v1615_v10 = vld [vmem:[%s2170_s5 + $0x28] sm:$0xff]   ;;  %v1617_v12 = vld [vmem:[%s2170_s5 + $0x20] sm:$0xff]   ;;  %v1618_v13 = vld [vmem:[%s2170_s5 + $0x58] sm:$0xff]  }
  0x59   :  { %v78_v42 = vrot.slane %v73_v39, %v77_v37  ;;  %v86_v43 = vrot.slane %v73_v39, %v85_v38  ;;  %v82_v44 = vrot.slane %v73_v39, %v81_v40  ;;  %v90_v45 = vrot.slane %v73_v39, %v89_v41  ;;  %v1619_v14 = vld [vmem:[%s2170_s5 + $0x18] sm:$0xff]   ;;  %v1620_v15 = vld [vmem:[%s2170_s5 + $0x50] sm:$0xff]   ;;  %v1622_v17 = vld [vmem:[%s2170_s5 + $0x48] sm:$0xff]  }
  0x5a   :  { %v1621_v16 = vld [vmem:[%s2170_s5 + $0x10] sm:$0xff]   ;;  %v1623_v18 = vld [vmem:[%s2170_s5 + $0x8] sm:$0xff]   ;;  %v1624_v19 = vld [vmem:[%s2170_s5 + $0x40] sm:$0xff]  }
  0x5b   :  { %774 = vmatpush2.bf16.msra.mxu0 %v1598_v28  ;;  %815 = vmatpush2.bf16.msra.mxu1 %v1601_v29  ;;  %v1625_v20 = vld [vmem:[%s2170_s5] sm:$0xff]   ;;  %v1626_v21 = vld [vmem:[%s2172_s7 + $0x38] sm:$0xff]   ;;  %v1627_v23 = vld [vmem:[%s2172_s7 + $0x30] sm:$0xff]  }
  0x5c   :  { %775 = vmatprep.subr.bf16.mxu0 %v1606_v30  ;;  %816 = vmatprep.subr.bf16.mxu1 %v1609_v31  ;;  %v1628_v24 = vld [vmem:[%s2172_s7 + $0x28] sm:$0xff]   ;;  %v1629_v25 = vld [vmem:[%s2172_s7 + $0x20] sm:$0xff]   ;;  %v1630_v26 = vld [vmem:[%s2172_s7 + $0x18] sm:$0xff]  }
  0x5d   :  { %v413_v27 = vld [vmem:[%s2169_s4] sm:$0x3]  ;;  %v1631_v36 = vld [vmem:[%s2172_s7 + $0x10] sm:$0xff]  }
  0x5e   :  { %v418_v28 = vrot.slane %v413_v27, %v77_v37  ;;  %v422_v29 = vrot.slane %v413_v27, %v81_v40  ;;  %v1632_v40 = vld [vmem:[%s2172_s7 + $0x8] sm:$0xff]  }
  0x5f   :  { %776 = vmatpush2.bf16.msra.mxu0 %v1604_v32  ;;  %817 = vmatpush2.bf16.msra.mxu1 %v1607_v33 }
  0x60   :  { %1382 = vmatprep.subr.bf16.mxu0 %v1610_v34  ;;  %1422 = vmatprep.subr.bf16.mxu1 %v1665_v22 }
  0xe2   :  { %v289_v46 = vpop.f32.mrf.mxu0  ;;  %v330_v47 = vpop.f32.mrf.mxu1 }
  0xe3   :  { %v290_v48 = vadd.f32 %v289_v46, %v78_v42  ;;  %v331_v49 = vadd.f32 %v330_v47, %v86_v43 }
  0xe4   :  { %v291_v50 = vpop.f32.mrf.mxu0  ;;  %v332_v51 = vpop.f32.mrf.mxu1 }
  0xe5   :  { %v337_v52 = vmul.f32 0.01, %v290_v48  ;;  %v339_v53 = vmul.f32 0.01, %v331_v49  ;;  %v292_v54 = vadd.f32 %v291_v50, %v82_v44  ;;  %v333_v55 = vadd.f32 %v332_v51, %v90_v45  ;;  %v1633_v50 = vld [vmem:[%s2172_s7] sm:$0xff]   ;;  %v1634_v51 = vld [vmem:[%s2174_s9 + $0x38] sm:$0xff]  }
  0xe6   :  { %v293_v56 = vpop.f32.mrf.mxu0  ;;  %v334_v57 = vpop.f32.mrf.mxu1 }
  0xe7   :  { %v338_v58 = vmul.f32 0.01, %v292_v54  ;;  %v340_v59 = vmul.f32 0.01, %v333_v55  ;;  %v341_v60 = vmax.f32 %v290_v48, %v337_v52  ;;  %v343_v61 = vmax.f32 %v331_v49, %v339_v53  ;;  %v1635_v52 = vld [vmem:[%s2174_s9 + $0x30] sm:$0xff]   ;;  %v1636_v53 = vld [vmem:[%s2174_s9 + $0x28] sm:$0xff]  }
  0xe8   :  { %v294_v62 = vpop.f32.mrf.mxu0  ;;  %v335_v63 = vpop.f32.mrf.mxu1  ;;  %v1639_v56 = vld [vmem:[%s2174_s9 + $0x10] sm:$0xff]  }
  0xe9   :  { %v342_v0 = vmax.f32 %v292_v54, %v338_v58  ;;  %v344_v1 = vmax.f32 %v333_v55, %v340_v59  ;;  %v345_v5 = vpack.c.bf16 %v341_v60, %v341_v60  ;;  %v347_v6 = vpack.c.bf16 %v343_v61, %v343_v61  ;;  %v1637_v54 = vld [vmem:[%s2174_s9 + $0x20] sm:$0xff]   ;;  %v1638_v55 = vld [vmem:[%s2174_s9 + $0x18] sm:$0xff]  }
  0xea   :  { %v1347_v58 = vld [vmem:[%s2171_s6] ss:$0 sm:$0xff] }
  0xeb   :  { %v346_v2 = vpack.c.bf16 %v342_v0, %v342_v0  ;;  %v348_v3 = vpack.c.bf16 %v344_v1, %v344_v1 }
  0xed   :  { %777 = vmatprep.mubr.bf16.mxu0 %v346_v2  ;;  %818 = vmatprep.mubr.bf16.mxu1 %v348_v3  ;;  %v1640_v3 = vld [vmem:[%s2174_s9 + $0x8] sm:$0xff]  }
  0xee   :  { %778 = vmatmul.mubr.bf16.vlgmr.msra.gmra.mxu0 %v345_v5  ;;  %819 = vmatmul.mubr.bf16.vlgmr.msra.gmra.mxu1 %v347_v6  ;;  %v1364_v5 = vld [vmem:[%s2173_s8] ss:$0 sm:$0xff] }
  0xef   :  { %1383 = vmatpush3.bf16.msra.mxu0 %v1611_v4  ;;  %1423 = vmatpush3.bf16.msra.mxu1 %v1626_v21  ;;  %v1641_v4 = vld [vmem:[%s2174_s9] sm:$0xff]   ;;  %s1243_s9 = sshll.u32 %s1667_s27, 4  ;;  %s1244_s9 = int_to_ptr.vmem [resolvable:$true] %s1243_s9 }
  0xf0   :  { %1384 = vmatprep.subr.bf16.mxu0 %v1612_v7  ;;  %1424 = vmatprep.subr.bf16.mxu1 %v1665_v22  ;;  %s1642_s8 = scalar_lea.vmem %s1244_s9, 128  ;;  %p1647_p1 = scmp.lt.s32.totalorder %s1244_s9, %s1244_s9 }
  0xf1   :  { %1438 = vmatprep.mubr.msk.bf16.mxu1 %vm1666_vm0, %v1665_v22  ;;  %p1643_p0 = scmp.ne.s32.totalorder %s1244_s9, %s1642_s8  ;;  %p1648_p2 = scmp.lt.s32.totalorder %s1642_s8, %s1642_s8 }
  0xf3   :  { %1385 = vmatpush3.bf16.msra.mxu0 %v1613_v8  ;;  %1425 = vmatpush3.bf16.msra.mxu1 %v1627_v23  ;;  %p1649_p3 = por %p1648_p2, %p1647_p1 }
  0xf4   :  { %1386 = vmatprep.subr.bf16.mxu0 %v1614_v9  ;;  %1426 = vmatprep.subr.bf16.mxu1 %v1665_v22 }
  0xf5   :  { %p1650_p4 = pnand %p1649_p3, %p1643_p0 }
  0xf7   :  { %1387 = vmatpush3.bf16.msra.mxu0 %v1615_v10  ;;  %1427 = vmatpush3.bf16.msra.mxu1 %v1628_v24 }
  0xf8   :  { %1388 = vmatprep.subr.bf16.mxu0 %v1616_v11  ;;  %1428 = vmatprep.subr.bf16.mxu1 %v1665_v22 }
  0xfb   :  { %1389 = vmatpush3.bf16.msra.mxu0 %v1617_v12  ;;  %1429 = vmatpush3.bf16.msra.mxu1 %v1629_v25 }
  0xfc   :  { %1390 = vmatprep.subr.bf16.mxu0 %v1618_v13  ;;  %1430 = vmatprep.subr.bf16.mxu1 %v1665_v22 }
  0xff   :  { %1391 = vmatpush3.bf16.msra.mxu0 %v1619_v14  ;;  %1431 = vmatpush3.bf16.msra.mxu1 %v1630_v26  ;;  %v1373_v14 = vld [vmem:[%s2175_s10] ss:$0 sm:$0xff] }
 0x100   :  { %1392 = vmatprep.subr.bf16.mxu0 %v1620_v15  ;;  %1432 = vmatprep.subr.bf16.mxu1 %v1665_v22 }
 0x103   :  { %1393 = vmatpush3.bf16.msra.mxu0 %v1621_v16  ;;  %1433 = vmatpush3.bf16.msra.mxu1 %v1631_v36 }
 0x104   :  { %1394 = vmatprep.subr.bf16.mxu0 %v1622_v17  ;;  %1434 = vmatprep.subr.bf16.mxu1 %v1665_v22 }
 0x107   :  { %1395 = vmatpush3.bf16.msra.mxu0 %v1623_v18  ;;  %1435 = vmatpush3.bf16.msra.mxu1 %v1632_v40 }
 0x108   :  { %1396 = vmatprep.subr.bf16.mxu0 %v1624_v19  ;;  %1436 = vmatprep.subr.bf16.mxu1 %v1665_v22 }
 0x10b   :  { %1397 = vmatpush3.bf16.msra.mxu0 %v1625_v20  ;;  %1437 = vmatpush3.bf16.msra.mxu1 %v1633_v50 }
 0x10c   :  { %1442 = vmatprep.subr.bf16.mxu0 %v1665_v22 }
 0x1ae   :  { %v779_v30 = vpop.f32.mrf.mxu0  ;;  %v820_v31 = vpop.f32.mrf.mxu1 }
 0x1af   :  { %v780_v32 = vadd.f32 %v779_v30, %v418_v28 }
 0x1b0   :  { %v781_v33 = vpop.f32.mrf.mxu0  ;;  %v822_v34 = vpop.f32.mrf.mxu1 }
 0x1b1   :  { %v821_v35 = vadd.f32 %v820_v31, %v780_v32  ;;  %v782_v38 = vadd.f32 %v781_v33, %v422_v29 }
 0x1b2   :  { %v783_v39 = vpop.f32.mrf.mxu0  ;;  %v824_v41 = vpop.f32.mrf.mxu1 }
 0x1b3   :  { %v827_v42 = vmul.f32 0.01, %v821_v35  ;;  %v823_v43 = vadd.f32 %v822_v34, %v782_v38 }
 0x1b4   :  { %v784_v44 = vpop.f32.mrf.mxu0  ;;  %v825_v45 = vpop.f32.mrf.mxu1 }
 0x1b5   :  { %v828_v46 = vmul.f32 0.01, %v823_v43  ;;  %v829_v47 = vmax.f32 %v821_v35, %v827_v42 }
 0x1b7   :  { %v830_v48 = vmax.f32 %v823_v43, %v828_v46  ;;  %v831_v49 = vpack.c.bf16 %v829_v47, %v829_v47 }
 0x1b9   :  { %v832_v37 = vpack.c.bf16 %v830_v48, %v830_v48 }
 0x1bb   :  { %1000 = vmatprep.mubr.bf16.mxu0 %v832_v37 }
 0x1bc   :  { %1001 = vmatmul.mubr.bf16.vlgmr.msra.gmra.mxu0 %v831_v49 }
 0x1bd   :  { %1458 = vmatprep.mubr.msk.bf16.mxu0 %vm1666_vm0, %v1665_v22  ;;  %1443 = vmatpush3.bf16.msra.mxu0 %v1634_v51 }
 0x1be   :  { %1444 = vmatprep.subr.bf16.mxu0 %v1665_v22 }
 0x1c1   :  { %1445 = vmatpush3.bf16.msra.mxu0 %v1635_v52 }
 0x1c2   :  { %1446 = vmatprep.subr.bf16.mxu0 %v1665_v22 }
 0x1c5   :  { %1447 = vmatpush3.bf16.msra.mxu0 %v1636_v53 }
 0x1c6   :  { %1448 = vmatprep.subr.bf16.mxu0 %v1665_v22 }
 0x1c9   :  { %1449 = vmatpush3.bf16.msra.mxu0 %v1637_v54 }
 0x1ca   :  { %1450 = vmatprep.subr.bf16.mxu0 %v1665_v22 }
 0x1cd   :  { %1451 = vmatpush3.bf16.msra.mxu0 %v1638_v55 }
 0x1ce   :  { %1452 = vmatprep.subr.bf16.mxu0 %v1665_v22 }
 0x1d1   :  { %1453 = vmatpush3.bf16.msra.mxu0 %v1639_v56 }
 0x1d2   :  { %1454 = vmatprep.subr.bf16.mxu0 %v1665_v22 }
 0x1d5   :  { %1455 = vmatpush3.bf16.msra.mxu0 %v1640_v3 }
 0x1d6   :  { %1456 = vmatprep.subr.bf16.mxu0 %v1665_v22 }
 0x1d9   :  { %1457 = vmatpush3.bf16.msra.mxu0 %v1641_v4 }
 0x27c   :  { %v1398_v57 = vpop.f32.mrf.mxu0 }
 0x27e   :  { %v1399_v59 = vpop.f32.mrf.mxu0 }
 0x27f   :  { %v1400_v60 = vadd.f32 %v1399_v59, %v1398_v57 }
 0x280   :  { %v1401_v61 = vpop.f32.mrf.mxu0 }
 0x281   :  { %v1003_v62 = vadd.f32 %v1400_v60, %v1347_v58 }
 0x282   :  { %v1402_v63 = vpop.f32.mrf.mxu0 }
 0x283   :  { %v1008_v0 = vmul.f32 0.01, %v1003_v62 }
 0x285   :  { %v1009_v1 = vmax.f32 %v1003_v62, %v1008_v0 }
 0x287   :  { %v1010_v2 = vpack.c.bf16 %v1009_v1, %v1009_v1 }
 0x289   :  { %1439 = vmatmul.mubr.bf16.vlgmr.msra.gmra.mxu1 %v1010_v2 }
 0x349   :  { %v1116_v6 = vpop.f32.mrf.mxu1 }
 0x34a   :  { %v1117_v7 = vadd.f32 %v1364_v5, %v1116_v6 }
 0x34b   :  { %v1440_v8 = vpop.f32.mrf.mxu1 }
 0x34c   :  { %v1122_v9 = vmul.f32 0.01, %v1117_v7 }
 0x34d   :  { %v1119_v10 = vpop.f32.mrf.mxu1 }
 0x34e   :  { %v1123_v11 = vmax.f32 %v1117_v7, %v1122_v9 }
 0x34f   :  { %v1441_v12 = vpop.f32.mrf.mxu1 }
 0x350   :  { %v1124_v13 = vpack.c.bf16 %v1123_v11, %v1123_v11 }
 0x352   :  { %1459 = vmatmul.mubr.bf16.vlgmr.msra.gmra.mxu0 %v1124_v13 }
 0x412   :  { %v1230_v15 = vpop.f32.mrf.mxu0 }
 0x413   :  { %v1231_v16 = vadd.f32 %v1373_v14, %v1230_v15 }
 0x414   :  { %v1460_v17 = vpop.f32.mrf.mxu0 }
 0x415   :  { %1236 = vst [vmem:[#allocation2] sm:$0xff] %v1231_v16 }
 0x416   :  { %v1233_v18 = vpop.f32.mrf.mxu0 }
 0x417   :  { %1653 = shalt.err (!%p1650_p4)
}
 0x418   :  { %1246 = dma.vmem_to_hbm [thread:$0]  %s1244_s9, 128, %s2176_s11, [#allocation3]   ;;  %v1461_v19 = vpop.f32.mrf.mxu0 }
 0x419   :  { %1662 = dma.done.wait [#allocation3], 128  }
 0x41a   :  { %1663 = vsyncadd [#allocation3], 4294967168 }
 0x41b   :  { %1250 = vsyncpa [#allocation3], 1 }

</bundles_post_ra>
